<compile_context>
chip_gen: v6e
topology: v6e:2x2x1
jax: 0.10.0
libtpu: 0.0.40
codegen_flags: <defaults>
</compile_context>

<pallas_src>
import functools

import jax
import jax.numpy as jnp
from jax import lax
from jax.experimental import pallas as pl
from jax.experimental.pallas import tpu as pltpu


def _round_up(x, m):
    return ((x + m - 1) // m) * m


def _cdiv(a, b):
    return -(-a // b)


# ---------------------------------------------------------------------------
# Fused kernel: one (64, TP) pixel tile of one batch image -> (240, TP)
# ---------------------------------------------------------------------------
def _fused_kernel(x_ref, w0_ref, b0_ref, w1_ref, b1_ref, w2b_ref, o_ref):
    x = x_ref[...]                                                   # (64, TP) f32

    # conv0 (64 -> 1): MXU matmul (keeps the (64,TP) product out of vregs/VALU).
    v1 = jnp.dot(w0_ref[...], x, preferred_element_type=jnp.float32)  # (1, TP)
    v1 = v1 + b0_ref[...]
    # tanh-GELU chain (v2..v10 of the PyTorch module).
    v10 = (v1 * 0.5) * (
        jnp.tanh((v1 + (v1 * v1 * v1) * 0.044715) * 0.7978845608028654) + 1.0)

    # conv1 (1 -> 8, zero-padded to 9 rows): broadcast outer product on the VPU.
    v11 = w1_ref[...] * v10 + b1_ref[...]                            # (9, TP)
    # pseudo-GELU tail (v12..v18; the module has no tanh here).
    v18 = (v11 * 0.5) * (v11 + (v11 * v11 * v11) * 0.044715 + 1.0)
    # Row 8 is a dummy channel that carries the conv2 bias through the matmul:
    # force it to ones (w1/b1 row 8 are zero, so tail(0)=0 -> overwrite with 1).
    rows = lax.broadcasted_iota(jnp.int32, v18.shape, 0)
    v18 = jnp.where(rows == 8, jnp.float32(1.0), v18)

    # conv2 (8 -> 240) on the MXU; bias folded in as column 8 of w2b (K=9).
    v19 = jnp.dot(w2b_ref[...], v18, preferred_element_type=jnp.float32)  # (240, TP)
    # pseudo-GELU tail (v20..v26), lane-dense store.
    o_ref[...] = (v19 * 0.5) * (v19 + (v19 * v19 * v19) * 0.044715 + 1.0)


def _fused_conv_chain(x3d, params, tile_p):
    """x3d: (N, 64, P) f32 channels x subsampled pixels.  Returns (N, 240, P)."""
    n, cin, p = x3d.shape
    cout = params["w2b"].shape[0]                                    # 240

    # Lane-dense pixel tile (multiple of 128).  Partial last block is handled
    # by Pallas masking -- no explicit pad / slice copies through HBM.
    tp = min(_round_up(tile_p, 128), _round_up(p, 128))
    # Give v7x's second TensorCore work when the grid would otherwise be 1 step.
    if n == 1 and p > 128 and _cdiv(p, tp) == 1:
        tp = _round_up(_cdiv(p, 2), 128)
    grid = (n, _cdiv(p, tp))

    const2 = lambda b, i: (0, 0)

    # Advisory cost estimate (per pixel: conv0 MXU dot, tanh tail, conv1
    # broadcast, conv2 K=9 matmul, two cubic tails).
    flops = n * p * (2 * cin + 10 + 2 * 9 + 7 * 9 + 2 * 9 * cout + 7 * cout)
    bytes_accessed = 4 * (n * p * (cin + cout) + cin + 1 + 9 + 9 + cout * 9)

    return pl.pallas_call(
        _fused_kernel,
        out_shape=jax.ShapeDtypeStruct((n, cout, p), jnp.float32),
        grid=grid,
        in_specs=[
            pl.BlockSpec((None, cin, tp), lambda b, i: (b, 0, i)),   # x pixels tile
            pl.BlockSpec((1, cin), const2),                          # w0 (1, 64)
            pl.BlockSpec((1, 1), const2),                            # b0 (1, 1)
            pl.BlockSpec((9, 1), const2),                            # w1 (9, 1), row 8 = 0
            pl.BlockSpec((9, 1), const2),                            # b1 (9, 1), row 8 = 0
            pl.BlockSpec((cout, 9), const2),                         # w2|b2 (240, 9)
        ],
        out_specs=pl.BlockSpec((None, cout, tp), lambda b, i: (b, 0, i)),
        compiler_params=pltpu.CompilerParams(
            dimension_semantics=("parallel", "parallel")),
        cost_estimate=pl.CostEstimate(
            flops=flops, transcendentals=n * p, bytes_accessed=bytes_accessed),
    )(x3d, params["w0"], params["b0"], params["w1"], params["b1"], params["w2b"])


# ---------------------------------------------------------------------------
# Model wrapper (NCHW in, NCHW out -- matches the PyTorch module)
# ---------------------------------------------------------------------------
@functools.partial(jax.jit, static_argnames=("tile_p",))
def model_forward(x_nchw, params, tile_p=2048):
    n, c, h, w = x_nchw.shape
    # Both stride-2 1x1 convs start at pixel 0, so only the ::4 grid of the
    # input contributes to the output.  Subsample first (exact).
    xs = x_nchw[:, :, ::4, ::4]                                      # (N, 64, H4, W4)
    h4, w4 = xs.shape[2], xs.shape[3]
    x3d = xs.reshape(n, c, h4 * w4)                                  # free reshape
    out3d = _fused_conv_chain(x3d, params, tile_p)                   # (N, 240, P)
    cout = out3d.shape[1]
    return out3d.reshape(n, cout, h4, w4)                            # free reshape


# ---------------------------------------------------------------------------
# Parameters (PyTorch Conv2d default: U(-1/sqrt(fan_in), 1/sqrt(fan_in)))
# ---------------------------------------------------------------------------
def _init_conv(key, cin, cout):
    kw, kb = jax.random.split(key)
    bound = 1.0 / (cin ** 0.5)
    w = jax.random.uniform(kw, (cout, cin), jnp.float32, -bound, bound)
    b = jax.random.uniform(kb, (cout,), jnp.float32, -bound, bound)
    return w, b


def pack_params(w0, b0, w1, b1, w2, b2):
    """Kernel layout: conv0 as an MXU row, conv1 zero-padded to 9 rows (row 8
    is the bias-carrier channel), conv2 bias folded as column 8 of w2b."""
    z1 = jnp.zeros((1, 1), jnp.float32)
    return {
        "w0": w0.reshape(1, -1).astype(jnp.float32),                        # (1, 64)
        "b0": b0.reshape(1, 1).astype(jnp.float32),                         # (1, 1)
        "w1": jnp.concatenate([w1.reshape(-1, 1), z1], axis=0),             # (9, 1)
        "b1": jnp.concatenate([b1.reshape(-1, 1), z1], axis=0),             # (9, 1)
        "w2b": jnp.concatenate([w2, b2.reshape(-1, 1)], axis=1),            # (240, 9)
    }


def _reference_forward(x, w0, b0, w1, b1, w2, b2):
    """Pure-JAX transcription of the PyTorch module (no pixel hoisting)."""
    v1 = jnp.einsum("nchw,oc->nohw", x, w0) + b0.reshape(1, -1, 1, 1)
    v10 = (0.5 * v1) * (jnp.tanh((v1 + 0.044715 * v1 ** 3) * 0.7978845608028654) + 1.0)
    v11 = jnp.einsum("nchw,oc->nohw", v10[:, :, ::2, ::2], w1) + b1.reshape(1, -1, 1, 1)
    v18 = (0.5 * v11) * (v11 + 0.044715 * v11 ** 3 + 1.0)     # module omits tanh here
    v19 = jnp.einsum("nchw,oc->nohw", v18[:, :, ::2, ::2], w2) + b2.reshape(1, -1, 1, 1)
    return (0.5 * v19) * (v19 + 0.044715 * v19 ** 3 + 1.0)


if __name__ == "__main__":
    key = jax.random.PRNGKey(0)
    kx, k0, k1, k2 = jax.random.split(key, 4)

    # Shape consistent with the module spec (Cin must be 64); matches x3.
    x = jax.random.normal(kx, (1, 64, 32, 32), jnp.float32)

    w0, b0 = _init_conv(k0, 64, 1)       # (1, 64), (1,)
    w1, b1 = _init_conv(k1, 1, 8)        # (8, 1),  (8,)
    w2, b2 = _init_conv(k2, 8, 240)      # (240, 8), (240,)
    params = pack_params(w0, b0, w1, b1, w2, b2)

    out = jax.block_until_ready(model_forward(x, params))
    ref = jax.block_until_ready(_reference_forward(x, w0, b0, w1, b1, w2, b2))
    assert out.shape == (1, 240, 8, 8), out.shape
    assert jnp.allclose(out, ref, rtol=1e-4, atol=1e-5), \
        float(jnp.max(jnp.abs(out - ref)))

    # Batch grid axis + masked partial last pixel block (P=99, TP=128).
    x2 = jax.random.normal(jax.random.PRNGKey(1), (2, 64, 44, 36), jnp.float32)
    out2 = jax.block_until_ready(model_forward(x2, params, tile_p=256))
    ref2 = jax.block_until_ready(_reference_forward(x2, w0, b0, w1, b1, w2, b2))
    assert out2.shape == ref2.shape, (out2.shape, ref2.shape)
    assert jnp.allclose(out2, ref2, rtol=1e-4, atol=1e-5), \
        float(jnp.max(jnp.abs(out2 - ref2)))

    # Single batch, multi-tile pixel grid (exercises the 2-TensorCore split).
    x3 = jax.random.normal(jax.random.PRNGKey(2), (1, 64, 64, 68), jnp.float32)
    out3 = jax.block_until_ready(model_forward(x3, params))
    ref3 = jax.block_until_ready(_reference_forward(x3, w0, b0, w1, b1, w2, b2))
    assert out3.shape == ref3.shape, (out3.shape, ref3.shape)
    assert jnp.allclose(out3, ref3, rtol=1e-4, atol=1e-5), \
        float(jnp.max(jnp.abs(out3 - ref3)))

    print("KERNEL_OK")
</pallas_src>

<mosaic_0001>
module attributes {stable_mosaic.version = 11 : i64} {
  func.func @_fused_kernel(%arg0: i32, %arg1: i32, %arg2: memref<1x64x128xf32, #tpu.memory_space<vmem>>, %arg3: memref<1x64xf32, #tpu.memory_space<vmem>>, %arg4: memref<1x1xf32, #tpu.memory_space<vmem>>, %arg5: memref<9x1xf32, #tpu.memory_space<vmem>>, %arg6: memref<9x1xf32, #tpu.memory_space<vmem>>, %arg7: memref<240x9xf32, #tpu.memory_space<vmem>>, %arg8: memref<1x240x128xf32, #tpu.memory_space<vmem>>) attributes {dimension_semantics = [#tpu.dimension_semantics<parallel>, #tpu.dimension_semantics<parallel>], iteration_bounds = array<i64: 1, 1>, scalar_prefetch = 0 : i64, scratch_operands = 0 : i64, tpu.core_type = #tpu.core_type<tc>, window_params = [{transform_indices = @transform_0, window_bounds = array<i64: 1, 64, 128>}, {pipeline_mode = #tpu.pipeline_mode<synchronous>, transform_indices = @transform_1, window_bounds = array<i64: 1, 64>}, {pipeline_mode = #tpu.pipeline_mode<synchronous>, transform_indices = @transform_2, window_bounds = array<i64: 1, 1>}, {pipeline_mode = #tpu.pipeline_mode<synchronous>, transform_indices = @transform_3, window_bounds = array<i64: 9, 1>}, {pipeline_mode = #tpu.pipeline_mode<synchronous>, transform_indices = @transform_4, window_bounds = array<i64: 9, 1>}, {pipeline_mode = #tpu.pipeline_mode<synchronous>, transform_indices = @transform_5, window_bounds = array<i64: 240, 9>}, {transform_indices = @transform_6, window_bounds = array<i64: 1, 240, 128>}]} {
    %c0 = arith.constant 0 : index
    %c0_0 = arith.constant 0 : index
    %c0_1 = arith.constant 0 : index
    %0 = vector.load %arg2[%c0, %c0_0, %c0_1] : memref<1x64x128xf32, #tpu.memory_space<vmem>>, vector<1x64x128xf32>
    %1 = vector.shape_cast %0 : vector<1x64x128xf32> to vector<64x128xf32>
    %c0_2 = arith.constant 0 : index
    %c0_3 = arith.constant 0 : index
    %2 = vector.load %arg3[%c0_2, %c0_3] : memref<1x64xf32, #tpu.memory_space<vmem>>, vector<1x64xf32>
    %cst = arith.constant dense<0.000000e+00> : vector<1x128xf32>
    %3 = tpu.matmul %2, %1, %cst {dimension_numbers = #tpu.dot_dimension_numbers<[1], [0], [0], [1], [0, 0, 1, 1], [], []>} : vector<1x64xf32>, vector<64x128xf32>, vector<1x128xf32> -> vector<1x128xf32>
    %c0_4 = arith.constant 0 : index
    %c0_5 = arith.constant 0 : index
    %4 = vector.load %arg4[%c0_4, %c0_5] : memref<1x1xf32, #tpu.memory_space<vmem>>, vector<1x1xf32>
    %5 = vector.broadcast %4 : vector<1x1xf32> to vector<1x128xf32>
    %6 = arith.addf %3, %5 : vector<1x128xf32>
    %cst_6 = arith.constant 5.000000e-01 : f32
    %7 = vector.broadcast %cst_6 : f32 to vector<1x128xf32>
    %8 = arith.mulf %6, %7 : vector<1x128xf32>
    %9 = arith.mulf %6, %6 : vector<1x128xf32>
    %10 = arith.mulf %9, %6 : vector<1x128xf32>
    %cst_7 = arith.constant 4.471500e-02 : f32
    %11 = vector.broadcast %cst_7 : f32 to vector<1x128xf32>
    %12 = arith.mulf %10, %11 : vector<1x128xf32>
    %13 = arith.addf %6, %12 : vector<1x128xf32>
    %cst_8 = arith.constant 0.797884583 : f32
    %14 = vector.broadcast %cst_8 : f32 to vector<1x128xf32>
    %15 = arith.mulf %13, %14 : vector<1x128xf32>
    %16 = math.tanh %15 : vector<1x128xf32>
    %cst_9 = arith.constant 1.000000e+00 : f32
    %17 = vector.broadcast %cst_9 : f32 to vector<1x128xf32>
    %18 = arith.addf %16, %17 : vector<1x128xf32>
    %19 = arith.mulf %8, %18 : vector<1x128xf32>
    %c0_10 = arith.constant 0 : index
    %c0_11 = arith.constant 0 : index
    %20 = vector.load %arg5[%c0_10, %c0_11] : memref<9x1xf32, #tpu.memory_space<vmem>>, vector<9x1xf32>
    %21 = vector.broadcast %20 : vector<9x1xf32> to vector<9x128xf32>
    %22 = vector.broadcast %19 : vector<1x128xf32> to vector<9x128xf32>
    %23 = arith.mulf %21, %22 : vector<9x128xf32>
    %c0_12 = arith.constant 0 : index
    %c0_13 = arith.constant 0 : index
    %24 = vector.load %arg6[%c0_12, %c0_13] : memref<9x1xf32, #tpu.memory_space<vmem>>, vector<9x1xf32>
    %25 = vector.broadcast %24 : vector<9x1xf32> to vector<9x128xf32>
    %26 = arith.addf %23, %25 : vector<9x128xf32>
    %cst_14 = arith.constant 5.000000e-01 : f32
    %27 = vector.broadcast %cst_14 : f32 to vector<9x128xf32>
    %28 = arith.mulf %26, %27 : vector<9x128xf32>
    %29 = arith.mulf %26, %26 : vector<9x128xf32>
    %30 = arith.mulf %29, %26 : vector<9x128xf32>
    %cst_15 = arith.constant 4.471500e-02 : f32
    %31 = vector.broadcast %cst_15 : f32 to vector<9x128xf32>
    %32 = arith.mulf %30, %31 : vector<9x128xf32>
    %33 = arith.addf %26, %32 : vector<9x128xf32>
    %cst_16 = arith.constant 1.000000e+00 : f32
    %34 = vector.broadcast %cst_16 : f32 to vector<9x128xf32>
    %35 = arith.addf %33, %34 : vector<9x128xf32>
    %36 = arith.mulf %28, %35 : vector<9x128xf32>
    %37 = tpu.iota {dimensions = array<i32: 0>} : vector<9x128xi32>
    %c8_i32 = arith.constant 8 : i32
    %38 = vector.broadcast %c8_i32 : i32 to vector<9x128xi32>
    %39 = arith.cmpi eq, %37, %38 : vector<9x128xi32>
    %cst_17 = arith.constant 1.000000e+00 : f32
    %40 = vector.broadcast %cst_17 : f32 to vector<9x128xf32>
    %41 = arith.select %39, %40, %36 : vector<9x128xi1>, vector<9x128xf32>
    %c0_18 = arith.constant 0 : index
    %c0_19 = arith.constant 0 : index
    %42 = vector.load %arg7[%c0_18, %c0_19] : memref<240x9xf32, #tpu.memory_space<vmem>>, vector<240x9xf32>
    %cst_20 = arith.constant dense<0.000000e+00> : vector<240x128xf32>
    %43 = tpu.matmul %42, %41, %cst_20 {dimension_numbers = #tpu.dot_dimension_numbers<[1], [0], [0], [1], [0, 0, 1, 1], [], []>} : vector<240x9xf32>, vector<9x128xf32>, vector<240x128xf32> -> vector<240x128xf32>
    %cst_21 = arith.constant 5.000000e-01 : f32
    %44 = vector.broadcast %cst_21 : f32 to vector<240x128xf32>
    %45 = arith.mulf %43, %44 : vector<240x128xf32>
    %46 = arith.mulf %43, %43 : vector<240x128xf32>
    %47 = arith.mulf %46, %43 : vector<240x128xf32>
    %cst_22 = arith.constant 4.471500e-02 : f32
    %48 = vector.broadcast %cst_22 : f32 to vector<240x128xf32>
    %49 = arith.mulf %47, %48 : vector<240x128xf32>
    %50 = arith.addf %43, %49 : vector<240x128xf32>
    %cst_23 = arith.constant 1.000000e+00 : f32
    %51 = vector.broadcast %cst_23 : f32 to vector<240x128xf32>
    %52 = arith.addf %50, %51 : vector<240x128xf32>
    %53 = arith.mulf %45, %52 : vector<240x128xf32>
    %c0_24 = arith.constant 0 : index
    %c0_25 = arith.constant 0 : index
    %c0_26 = arith.constant 0 : index
    %54 = vector.load %arg8[%c0_24, %c0_25, %c0_26] : memref<1x240x128xf32, #tpu.memory_space<vmem>>, vector<1x240x128xf32>
    %55 = vector.shape_cast %54 : vector<1x240x128xf32> to vector<240x128xf32>
    %56 = vector.shape_cast %53 : vector<240x128xf32> to vector<1x240x128xf32>
    tpu.vector_store %arg8[%c0_24, %c0_25, %c0_26], %56 {strides = array<i32>} : memref<1x240x128xf32, #tpu.memory_space<vmem>>, vector<1x240x128xf32>,
    return
  }
  func.func @transform_0(%arg0: i32, %arg1: i32) -> (i32, i32, i32) {
    %c0_i32 = arith.constant 0 : i32
    %c0_i32_0 = arith.constant 0 : i32
    return %arg0, %c0_i32, %arg1 : i32, i32, i32
  }
  func.func @transform_1(%arg0: i32, %arg1: i32) -> (i32, i32) {
    %c0_i32 = arith.constant 0 : i32
    %c0_i32_0 = arith.constant 0 : i32
    %c0_i32_1 = arith.constant 0 : i32
    return %c0_i32, %c0_i32_0 : i32, i32
  }
  func.func @transform_2(%arg0: i32, %arg1: i32) -> (i32, i32) {
    %c0_i32 = arith.constant 0 : i32
    %c0_i32_0 = arith.constant 0 : i32
    %c0_i32_1 = arith.constant 0 : i32
    return %c0_i32, %c0_i32_0 : i32, i32
  }
  func.func @transform_3(%arg0: i32, %arg1: i32) -> (i32, i32) {
    %c0_i32 = arith.constant 0 : i32
    %c0_i32_0 = arith.constant 0 : i32
    %c0_i32_1 = arith.constant 0 : i32
    return %c0_i32, %c0_i32_0 : i32, i32
  }
  func.func @transform_4(%arg0: i32, %arg1: i32) -> (i32, i32) {
    %c0_i32 = arith.constant 0 : i32
    %c0_i32_0 = arith.constant 0 : i32
    %c0_i32_1 = arith.constant 0 : i32
    return %c0_i32, %c0_i32_0 : i32, i32
  }
  func.func @transform_5(%arg0: i32, %arg1: i32) -> (i32, i32) {
    %c0_i32 = arith.constant 0 : i32
    %c0_i32_0 = arith.constant 0 : i32
    %c0_i32_1 = arith.constant 0 : i32
    return %c0_i32, %c0_i32_0 : i32, i32
  }
  func.func @transform_6(%arg0: i32, %arg1: i32) -> (i32, i32, i32) {
    %c0_i32 = arith.constant 0 : i32
    %c0_i32_0 = arith.constant 0 : i32
    return %arg0, %c0_i32, %arg1 : i32, i32, i32
  }
}

</mosaic_0001>

<bundles_post_ra>
// kernel: model_forward.1
= control target key start
LH: loop header
LB: loop body
LE: loop exit
PB: predicated region body
PF: predicated region fallthrough
CT: control target
= control target key end

     0   :  { %v916_v0 = vmov 0.0   ;;  %vm917_vm0 = vmmov 0   ;;  %v918_v4 = vmov 0   ;;  %vm44_vm1 = vcmask 523264   ;;  %s1255_s0 = inlined_call_operand.vmem [shape: f32[1,64,64], index: 0, kind: input, shape index: {}]   ;;  %s1256_s2 = inlined_call_operand.<no memory space> [shape: f32[1,1], index: 2, kind: input, shape index: {}]   ;;  %s1257_s4 = inlined_call_operand.vmem [shape: f32[9,1], index: 4, kind: input, shape index: {}]   ;;  %s1258_s3 = inlined_call_operand.vmem [shape: f32[9,1], index: 3, kind: input, shape index: {}]   ;;  %s1259_s1 = inlined_call_operand.vmem [shape: f32[1,64], index: 1, kind: input, shape index: {}]   ;;  %s1260_s5 = inlined_call_operand.vmem [shape: f32[240,9], index: 5, kind: input, shape index: {}]   ;;  %s1261_s6 = inlined_call_operand.vmem [shape: f32[1,240,64], index: 6, kind: output, shape index: {}]  }
   0x1   :  { %837 = vmatprep.subr.mxu0 %v916_v0  ;;  %v32_v1 = vld [vmem:[%s1255_s0 + $0x38] sm:$0xff]  ;;  %v31_v2 = vld [vmem:[%s1255_s0 + $0x30] sm:$0xff]  ;;  %853 = vmatprep.mubr.msk.f32.mxu0 %vm917_vm0, %v916_v0  ;;  %v11_v3 = vstv %s1256_s2  ;;  %v30_v5 = vld [vmem:[%s1255_s0 + $0x28] sm:$0xff]  ;;  %vm210_vm2 = vcmask 72704   ;;  %v40_v19 = vlaneseq  ;;  %vm301_vm4 = vcmask 1040384  }
   0x2   :  { %838 = vmatpush3.msra.mxu0 %v32_v1  ;;  %912 = vset.pattern.permute.xlu0 %v918_v4  ;;  %12 = vst [vmem:[#allocation2] sm:$0x1] %v11_v3  ;;  %v146_v6 = vld [vmem:[%s1257_s4 + $0x8] sm:$0x1]  ;;  %v29_v7 = vld [vmem:[%s1255_s0 + $0x20] sm:$0xff]  ;;  %v28_v9 = vld [vmem:[%s1255_s0 + $0x18] sm:$0xff] }
   0x3   :  { %839 = vmatprep.subr.mxu0 %v916_v0  ;;  %913 = vset.pattern.permute.xlu1 %v918_v4  ;;  %v127_v8 = vld [vmem:[%s1258_s3] sm:$0xff]  ;;  %v27_v10 = vld [vmem:[%s1255_s0 + $0x10] sm:$0xff]  ;;  %v26_v12 = vld [vmem:[%s1255_s0 + $0x8] sm:$0xff]  ;;  %v41_v20 = vshrl.u32 %v40_v19, 7 }
   0x4   :  { %840 = vmatpush3.msra.mxu0 %v31_v2  ;;  %154 = vperm.xlu1 %913, %v146_v6   ;;  %v128_v13 = vld [vmem:[%s1258_s3 + $0x8] sm:$0x1]  ;;  %v25_v14 = vld [vmem:[%s1255_s0] sm:$0xff]  ;;  %v190_v17 = vld [vmem:[%s1260_s5 + $0x50] sm:$0xff] }
   0x5   :  { %841 = vmatprep.subr.mxu0 %v916_v0  ;;  %v33_v15 = vld [vmem:[%s1259_s1] sm:$0x1]  ;;  %875 = vmatprep.mubr.msk.f32.mxu1 %vm210_vm2, %v190_v17  ;;  %v42_v21 = vsub.s32 0, %v41_v20  ;;  %v175_v51 = vadd.s32 8, %v41_v20  ;;  %v191_v61 = vld [vmem:[%s1260_s5 + $0x58] sm:$0xff]  ;;  %v181_v62 = vld [vmem:[%s1260_s5 + $0x8] sm:$0xff] }
   0x6   :  { %842 = vmatpush3.msra.mxu0 %v30_v5  ;;  %v145_v16 = vld [vmem:[%s1257_s4] sm:$0xff]  ;;  %v193_v1 = vld [vmem:[%s1260_s5 + $0x68] sm:$0xff]  ;;  %v183_v2 = vld [vmem:[%s1260_s5 + $0x18] sm:$0xff] }
   0x7   :  { %843 = vmatprep.subr.mxu0 %v916_v0  ;;  %v180_v18 = vld [vmem:[%s1260_s5] sm:$0xff]  ;;  %vm177_vm3 = vcmp.eq.s32.totalorder %v175_v51, 8  ;;  %v194_v3 = vld [vmem:[%s1260_s5 + $0x70] sm:$0xff]  ;;  %v195_v5 = vld [vmem:[%s1260_s5 + $0x78] sm:$0xff] }
   0x8   :  { %844 = vmatpush3.msra.mxu0 %v29_v7  ;;  %131 = vperm.xlu1 %913, %v127_v8   ;;  %v192_v63 = vld [vmem:[%s1260_s5 + $0x60] sm:$0xff]  ;;  %v185_v6 = vld [vmem:[%s1260_s5 + $0x28] sm:$0xff]  ;;  %v186_v8 = vld [vmem:[%s1260_s5 + $0x30] sm:$0xff] }
   0x9   :  { %845 = vmatprep.subr.mxu0 %v916_v0  ;;  %v34_v11 = vld [vmem:[#allocation2] sm:$0x1]  ;;  %v202_v17 = vld [vmem:[%s1260_s5 + $0xb0] sm:$0xff]  ;;  %v205_v20 = vld [vmem:[%s1260_s5 + $0xc8] sm:$0xff] }
   0xa   :  { %846 = vmatpush3.msra.mxu0 %v28_v9  ;;  %37 = vperm.xlu0 %912, %v34_v11   ;;  %v184_v4 = vld [vmem:[%s1260_s5 + $0x20] sm:$0xff]  ;;  %v197_v9 = vld [vmem:[%s1260_s5 + $0x88] sm:$0xff]  ;;  %v198_v11 = vld [vmem:[%s1260_s5 + $0x90] sm:$0xff] }
   0xb   :  { %847 = vmatprep.subr.mxu0 %v916_v0  ;;  %v196_v7 = vld [vmem:[%s1260_s5 + $0x80] sm:$0xff] }
   0xc   :  { %848 = vmatpush3.msra.mxu0 %v27_v10  ;;  %v187_v10 = vld [vmem:[%s1260_s5 + $0x38] sm:$0xff]  ;;  %v204_v19 = vld [vmem:[%s1260_s5 + $0xc0] sm:$0xff] }
   0xd   :  { %849 = vmatprep.subr.mxu0 %v916_v0 }
   0xe   :  { %850 = vmatpush3.msra.mxu0 %v26_v12  ;;  %136 = vperm.xlu0 %912, %v128_v13   ;;  %v188_v12 = vld [vmem:[%s1260_s5 + $0x40] sm:$0xff]  ;;  %v199_v13 = vld [vmem:[%s1260_s5 + $0x98] sm:$0xff] }
   0xf   :  { %851 = vmatprep.subr.mxu0 %v916_v0  ;;  %v182_v0 = vld [vmem:[%s1260_s5 + $0x10] sm:$0xff] }
  0x10   :  { %852 = vmatpush3.msra.mxu0 %v25_v14  ;;  %v189_v14 = vld [vmem:[%s1260_s5 + $0x48] sm:$0xff] }
  0x11   :  { %854 = vmatmul.mubr.msk.f32.vlgmr.msra.gmra.mxu0 %vm44_vm1, %v33_v15  ;;  %v200_v15 = vld [vmem:[%s1260_s5 + $0xa0] sm:$0xff] }
  0x12   :  { %149 = vperm.xlu0 %912, %v145_v16   ;;  %860 = vmatprep.mubr.msk.f32.mxu0 %vm210_vm2, %v180_v18  ;;  %v201_v16 = vld [vmem:[%s1260_s5 + $0xa8] sm:$0xff]  ;;  %v203_v18 = vld [vmem:[%s1260_s5 + $0xb8] sm:$0xff] }
  0x7f   :  { %v155_v32 = vpop.permute.xlu1 %154 }
  0x83   :  { %v132_v38 = vpop.permute.xlu1 %131 }
  0x85   :  { %v38_v22 = vpop.permute.xlu0 %37 }
  0x86   :  { %v43_v23 = vrot.slane %v38_v22, %v42_v21  ;;  %v207_v22 = vld [vmem:[%s1260_s5 + $0xd8] sm:$0xff] }
  0x89   :  { %v137_v36 = vpop.permute.xlu0 %136 }
  0x8d   :  { %v150_v42 = vpop.permute.xlu0 %149 }
  0xd1   :  { %v114_v24 = vpop.f32.mrf.mxu0 }
  0xd2   :  { %v115_v25 = vadd.f32 %v114_v24, %v43_v23  ;;  %v208_v23 = vld [vmem:[%s1260_s5 + $0xe0] sm:$0xff]  ;;  %v209_v24 = vld [vmem:[%s1260_s5 + $0xe8] sm:$0xff] }
  0xd3   :  { %v855_v26 = vpop.f32.mrf.mxu0 }
  0xd4   :  { %v119_v27 = vmul.f32 %v115_v25, %v115_v25  ;;  %v118_v34 = vmul.f32 0.5, %v115_v25 }
  0xd6   :  { %v120_v28 = vmul.f32 %v119_v27, %v115_v25 }
  0xd8   :  { %v121_v29 = vmul.f32 0.044715, %v120_v28 }
  0xda   :  { %v122_v30 = vadd.f32 %v121_v29, %v115_v25 }
  0xdc   :  { %v123_v31 = vmul.f32 0.7978846, %v122_v30 }
  0xde   :  { %914 = vtanh.f32 %v123_v31 }
  0xeb   :  { %v915_v33 = vpop.eup %914 }
  0xec   :  { %v125_v35 = vadd.f32 1.0, %v915_v33 }
  0xee   :  { %v126_v37 = vmul.f32 %v125_v35, %v118_v34 }
  0xf0   :  { %v142_v39 = vrot.slane %v126_v37, %v42_v21  ;;  %v206_v21 = vld [vmem:[%s1260_s5 + $0xd0] sm:$0xff] }
  0xf2   :  { %v144_v40 = vmul.f32 %v142_v39, %v137_v36  ;;  %v143_v41 = vmul.f32 %v142_v39, %v132_v38 }
  0xf4   :  { %v158_v43 = vadd.f32 %v155_v32, %v144_v40  ;;  %v157_v44 = vadd.f32 %v150_v42, %v143_v41 }
  0xf6   :  { %v162_v45 = vmul.f32 %v158_v43, %v158_v43  ;;  %v161_v46 = vmul.f32 %v157_v44, %v157_v44  ;;  %v160_v54 = vmul.f32 0.5, %v158_v43  ;;  %v159_v58 = vmul.f32 0.5, %v157_v44 }
  0xf8   :  { %v164_v47 = vmul.f32 %v162_v45, %v158_v43  ;;  %v163_v48 = vmul.f32 %v161_v46, %v157_v44 }
  0xfa   :  { %v166_v49 = vmul.f32 0.044715, %v164_v47  ;;  %v165_v50 = vmul.f32 0.044715, %v163_v48 }
  0xfc   :  { %v168_v52 = vadd.f32 %v166_v49, %v158_v43  ;;  %v167_v53 = vadd.f32 %v165_v50, %v157_v44 }
  0xfe   :  { %v170_v55 = vadd.f32 1.0, %v168_v52  ;;  %v169_v56 = vadd.f32 1.0, %v167_v53 }
 0x100   :  { %v172_v57 = vmul.f32 %v170_v55, %v160_v54  ;;  %v171_v60 = vmul.f32 %v169_v56, %v159_v58 }
 0x102   :  { %v179_v59 = vsel %vm177_vm3, 1.0, %v172_v57 }
 0x103   :  { %856 = vmatprep.subr.msk.mxu0 %vm301_vm4, %v179_v59  ;;  %905 = vmatprep.subr.msk.mxu1 %vm301_vm4, %v179_v59 }
 0x104   :  { %857 = vmatpush3.msk.msra.mxu0 %vm301_vm4, %v179_v59  ;;  %907 = vmatpush3.msk.msra.mxu1 %vm301_vm4, %v179_v59 }
 0x105   :  { %858 = vmatprep.subr.mxu0 %v171_v60  ;;  %906 = vmatprep.subr.mxu1 %v171_v60 }
 0x106   :  { %859 = vmatpush3.msra.mxu0 %v171_v60  ;;  %908 = vmatpush3.msra.mxu1 %v171_v60 }
 0x107   :  { %876 = vmatmul.mubr.msk.f32.vlgmr.msra.gmra.mxu1 %vm210_vm2, %v191_v61  ;;  %861 = vmatmul.mubr.msk.f32.vlgmr.msra.gmra.mxu0 %vm210_vm2, %v181_v62 }
 0x108   :  { %878 = vmatprep.mubr.msk.f32.mxu1 %vm210_vm2, %v192_v63  ;;  %863 = vmatprep.mubr.msk.f32.mxu0 %vm210_vm2, %v182_v0 }
 0x10b   :  { %879 = vmatmul.mubr.msk.f32.gmra.mxu1 %vm210_vm2, %v193_v1  ;;  %864 = vmatmul.mubr.msk.f32.gmra.mxu0 %vm210_vm2, %v183_v2 }
 0x10c   :  { %881 = vmatprep.mubr.msk.f32.mxu1 %vm210_vm2, %v194_v3  ;;  %866 = vmatprep.mubr.msk.f32.mxu0 %vm210_vm2, %v184_v4 }
 0x10f   :  { %882 = vmatmul.mubr.msk.f32.gmra.mxu1 %vm210_vm2, %v195_v5  ;;  %867 = vmatmul.mubr.msk.f32.gmra.mxu0 %vm210_vm2, %v185_v6 }
 0x110   :  { %884 = vmatprep.mubr.msk.f32.mxu1 %vm210_vm2, %v196_v7  ;;  %869 = vmatprep.mubr.msk.f32.mxu0 %vm210_vm2, %v186_v8 }
 0x113   :  { %885 = vmatmul.mubr.msk.f32.gmra.mxu1 %vm210_vm2, %v197_v9  ;;  %870 = vmatmul.mubr.msk.f32.gmra.mxu0 %vm210_vm2, %v187_v10 }
 0x114   :  { %887 = vmatprep.mubr.msk.f32.mxu1 %vm210_vm2, %v198_v11  ;;  %872 = vmatprep.mubr.msk.f32.mxu0 %vm210_vm2, %v188_v12 }
 0x117   :  { %888 = vmatmul.mubr.msk.f32.gmra.mxu1 %vm210_vm2, %v199_v13  ;;  %873 = vmatmul.mubr.msk.f32.gmra.mxu0 %vm210_vm2, %v189_v14 }
 0x118   :  { %890 = vmatprep.mubr.msk.f32.mxu1 %vm210_vm2, %v200_v15 }
 0x11b   :  { %891 = vmatmul.mubr.msk.f32.gmra.mxu1 %vm210_vm2, %v201_v16 }
 0x11c   :  { %893 = vmatprep.mubr.msk.f32.mxu1 %vm210_vm2, %v202_v17 }
 0x11f   :  { %894 = vmatmul.mubr.msk.f32.gmra.mxu1 %vm210_vm2, %v203_v18 }
 0x120   :  { %896 = vmatprep.mubr.msk.f32.mxu1 %vm210_vm2, %v204_v19 }
 0x123   :  { %897 = vmatmul.mubr.msk.f32.gmra.mxu1 %vm210_vm2, %v205_v20 }
 0x124   :  { %899 = vmatprep.mubr.msk.f32.mxu1 %vm210_vm2, %v206_v21 }
 0x127   :  { %900 = vmatmul.mubr.msk.f32.gmra.mxu1 %vm210_vm2, %v207_v22 }
 0x128   :  { %902 = vmatprep.mubr.msk.f32.mxu1 %vm210_vm2, %v208_v23 }
 0x12b   :  { %903 = vmatmul.mubr.msk.f32.gmra.mxu1 %vm210_vm2, %v209_v24 }
 0x1c7   :  { %v877_v25 = vpop.f32.mrf.mxu1  ;;  %v862_v26 = vpop.f32.mrf.mxu0 }
 0x1c8   :  { %v561_v27 = vmul.f32 %v877_v25, %v877_v25  ;;  %v551_v28 = vmul.f32 %v862_v26, %v862_v26  ;;  %v531_v34 = vmul.f32 0.5, %v877_v25  ;;  %v521_v40 = vmul.f32 0.5, %v862_v26 }
 0x1c9   :  { %v421_v29 = vpop.f32.mrf.mxu1  ;;  %v371_v30 = vpop.f32.mrf.mxu0 }
 0x1ca   :  { %v591_v31 = vmul.f32 %v877_v25, %v561_v27  ;;  %v560_v32 = vmul.f32 %v421_v29, %v421_v29  ;;  %v581_v33 = vmul.f32 %v862_v26, %v551_v28  ;;  %v550_v36 = vmul.f32 %v371_v30, %v371_v30 }
 0x1cb   :  { %v880_v35 = vpop.f32.mrf.mxu1  ;;  %v530_v41 = vmul.f32 0.5, %v421_v29  ;;  %v520_v44 = vmul.f32 0.5, %v371_v30  ;;  %v865_v46 = vpop.f32.mrf.mxu0 }
 0x1cc   :  { %v621_v37 = vmul.f32 0.044715, %v591_v31  ;;  %v590_v38 = vmul.f32 %v560_v32, %v421_v29  ;;  %v563_v39 = vmul.f32 %v880_v35, %v880_v35  ;;  %v611_v43 = vmul.f32 0.044715, %v581_v33 }
 0x1cd   :  { %v431_v42 = vpop.f32.mrf.mxu1  ;;  %v580_v45 = vmul.f32 %v550_v36, %v371_v30  ;;  %v553_v50 = vmul.f32 %v865_v46, %v865_v46  ;;  %v533_v51 = vmul.f32 0.5, %v880_v35  ;;  %v523_v59 = vmul.f32 0.5, %v865_v46  ;;  %v381_v10 = vpop.f32.mrf.mxu0 }
 0x1ce   :  { %v651_v47 = vadd.f32 %v877_v25, %v621_v37  ;;  %v620_v48 = vmul.f32 0.044715, %v590_v38  ;;  %v593_v49 = vmul.f32 %v880_v35, %v563_v39  ;;  %v562_v52 = vmul.f32 %v431_v42, %v431_v42 }
 0x1cf   :  { %v883_v53 = vpop.f32.mrf.mxu1  ;;  %v641_v54 = vadd.f32 %v862_v26, %v611_v43  ;;  %v610_v55 = vmul.f32 0.044715, %v580_v45  ;;  %v583_v4 = vmul.f32 %v865_v46, %v553_v50  ;;  %v532_v13 = vmul.f32 0.5, %v431_v42 }
 0x1d0   :  { %v681_v56 = vadd.f32 1.0, %v651_v47  ;;  %v650_v57 = vadd.f32 %v620_v48, %v421_v29  ;;  %v623_v58 = vmul.f32 0.044715, %v593_v49  ;;  %v592_v60 = vmul.f32 %v562_v52, %v431_v42  ;;  %v868_v29 = vpop.f32.mrf.mxu0 }
 0x1d1   :  { %v565_v61 = vmul.f32 %v883_v53, %v883_v53  ;;  %v671_v62 = vadd.f32 1.0, %v641_v54  ;;  %v441_v63 = vpop.f32.mrf.mxu1  ;;  %v640_v0 = vadd.f32 %v610_v55, %v371_v30  ;;  %v535_v21 = vmul.f32 0.5, %v883_v53 }
 0x1d2   :  { %v711_v1 = vmul.f32 %v681_v56, %v531_v34  ;;  %v680_v2 = vadd.f32 1.0, %v650_v57  ;;  %v653_v3 = vadd.f32 %v880_v35, %v623_v58  ;;  %v622_v5 = vmul.f32 0.044715, %v592_v60 }
 0x1d3   :  { %v595_v6 = vmul.f32 %v883_v53, %v565_v61  ;;  %v701_v7 = vmul.f32 %v671_v62, %v521_v40  ;;  %v564_v8 = vmul.f32 %v441_v63, %v441_v63  ;;  %v886_v9 = vpop.f32.mrf.mxu1  ;;  %v670_v14 = vadd.f32 1.0, %v640_v0 }
 0x1d4   :  { %741 = vst [vmem:[%s1261_s6 + $0x58] sm:$0xff] %v711_v1  ;;  %v710_v11 = vmul.f32 %v680_v2, %v530_v41  ;;  %v683_v12 = vadd.f32 1.0, %v653_v3  ;;  %v652_v15 = vadd.f32 %v622_v5, %v431_v42  ;;  %v567_v18 = vmul.f32 %v886_v9, %v886_v9 }
 0x1d5   :  { %v625_v16 = vmul.f32 0.044715, %v595_v6  ;;  %731 = vst [vmem:[%s1261_s6 + $0x8] sm:$0xff] %v701_v7  ;;  %v594_v17 = vmul.f32 %v564_v8, %v441_v63  ;;  %v451_v19 = vpop.f32.mrf.mxu1  ;;  %v700_v22 = vmul.f32 %v670_v14, %v520_v44  ;;  %v613_v23 = vmul.f32 0.044715, %v583_v4 }
 0x1d6   :  { %740 = vst [vmem:[%s1261_s6 + $0x50] sm:$0xff] %v710_v11  ;;  %v713_v20 = vmul.f32 %v683_v12, %v533_v51  ;;  %v682_v24 = vadd.f32 1.0, %v652_v15  ;;  %v597_v27 = vmul.f32 %v886_v9, %v567_v18  ;;  %v534_v30 = vmul.f32 0.5, %v441_v63 }
 0x1d7   :  { %v655_v25 = vadd.f32 %v883_v53, %v625_v16  ;;  %v624_v26 = vmul.f32 0.044715, %v594_v17  ;;  %v889_v28 = vpop.f32.mrf.mxu1  ;;  %730 = vst [vmem:[%s1261_s6] sm:$0xff] %v700_v22  ;;  %v643_v31 = vadd.f32 %v865_v46, %v613_v23  ;;  %v566_v32 = vmul.f32 %v451_v19, %v451_v19  ;;  %v391_v46 = vpop.f32.mrf.mxu0 }
 0x1d8   :  { %743 = vst [vmem:[%s1261_s6 + $0x68] sm:$0xff] %v713_v20  ;;  %v552_v33 = vmul.f32 %v381_v10, %v381_v10  ;;  %v712_v34 = vmul.f32 %v682_v24, %v532_v13  ;;  %v627_v37 = vmul.f32 0.044715, %v597_v27  ;;  %v537_v39 = vmul.f32 0.5, %v886_v9 }
 0x1d9   :  { %v685_v35 = vadd.f32 1.0, %v655_v25  ;;  %v654_v36 = vadd.f32 %v624_v26, %v441_v63  ;;  %v461_v38 = vpop.f32.mrf.mxu1  ;;  %v673_v40 = vadd.f32 1.0, %v643_v31  ;;  %v596_v41 = vmul.f32 %v566_v32, %v451_v19  ;;  %v871_v2 = vpop.f32.mrf.mxu0 }
 0x1da   :  { %v582_v42 = vmul.f32 %v552_v33, %v381_v10  ;;  %742 = vst [vmem:[%s1261_s6 + $0x60] sm:$0xff] %v712_v34  ;;  %v657_v45 = vadd.f32 %v886_v9, %v627_v37  ;;  %v569_v47 = vmul.f32 %v889_v28, %v889_v28  ;;  %v536_v50 = vmul.f32 0.5, %v451_v19 }
 0x1db   :  { %v715_v43 = vmul.f32 %v685_v35, %v535_v21  ;;  %v684_v44 = vadd.f32 1.0, %v654_v36  ;;  %v892_v48 = vpop.f32.mrf.mxu1  ;;  %v703_v49 = vmul.f32 %v673_v40, %v523_v59  ;;  %v626_v51 = vmul.f32 0.044715, %v596_v41  ;;  %v401_v21 = vpop.f32.mrf.mxu0 }
 0x1dc   :  { %v612_v52 = vmul.f32 0.044715, %v582_v42  ;;  %v687_v54 = vadd.f32 1.0, %v657_v45  ;;  %v599_v55 = vmul.f32 %v889_v28, %v569_v47  ;;  %v555_v56 = vmul.f32 %v868_v29, %v868_v29 }
 0x1dd   :  { %745 = vst [vmem:[%s1261_s6 + $0x78] sm:$0xff] %v715_v43  ;;  %v714_v53 = vmul.f32 %v684_v44, %v534_v30  ;;  %v1137_v57 = vpop.f32.mrf.mxu1  ;;  %733 = vst [vmem:[%s1261_s6 + $0x18] sm:$0xff] %v703_v49  ;;  %v656_v58 = vadd.f32 %v626_v51, %v451_v19  ;;  %v522_v60 = vmul.f32 0.5, %v381_v10  ;;  %v568_v61 = vmul.f32 %v461_v38, %v461_v38  ;;  %v874_v40 = vpop.f32.mrf.mxu0 }
 0x1de   :  { %v642_v59 = vadd.f32 %v612_v52, %v381_v10  ;;  %v717_v62 = vmul.f32 %v687_v54, %v537_v39  ;;  %v539_v63 = vmul.f32 0.5, %v889_v28  ;;  %v629_v0 = vmul.f32 0.044715, %v599_v55 }
 0x1df   :  { %744 = vst [vmem:[%s1261_s6 + $0x70] sm:$0xff] %v714_v53  ;;  %v585_v1 = vmul.f32 %v868_v29, %v555_v56  ;;  %v1145_v3 = vpop.f32.mrf.mxu1  ;;  %v686_v4 = vadd.f32 1.0, %v656_v58  ;;  %v598_v6 = vmul.f32 %v568_v61, %v461_v38  ;;  %v554_v7 = vmul.f32 %v391_v46, %v391_v46 }
 0x1e0   :  { %v672_v5 = vadd.f32 1.0, %v642_v59  ;;  %747 = vst [vmem:[%s1261_s6 + $0x88] sm:$0xff] %v717_v62  ;;  %v659_v8 = vadd.f32 %v889_v28, %v629_v0  ;;  %v525_v9 = vmul.f32 0.5, %v868_v29  ;;  %v571_v11 = vmul.f32 %v892_v48, %v892_v48 }
 0x1e1   :  { %v615_v10 = vmul.f32 0.044715, %v585_v1  ;;  %v1150_v12 = vpop.f32.mrf.mxu1  ;;  %v716_v13 = vmul.f32 %v686_v4, %v536_v50  ;;  %v628_v15 = vmul.f32 0.044715, %v598_v6  ;;  %v584_v16 = vmul.f32 %v554_v7, %v391_v46 }
 0x1e2   :  { %v702_v14 = vmul.f32 %v672_v5, %v522_v60  ;;  %v689_v17 = vadd.f32 1.0, %v659_v8  ;;  %v538_v19 = vmul.f32 0.5, %v461_v38  ;;  %v601_v20 = vmul.f32 %v892_v48, %v571_v11  ;;  %v411_v60 = vpop.f32.mrf.mxu0 }
 0x1e3   :  { %v645_v18 = vadd.f32 %v868_v29, %v615_v10  ;;  %v1152_v22 = vpop.f32.mrf.mxu1  ;;  %746 = vst [vmem:[%s1261_s6 + $0x80] sm:$0xff] %v716_v13  ;;  %v658_v23 = vadd.f32 %v628_v15, %v461_v38  ;;  %v524_v24 = vmul.f32 0.5, %v391_v46  ;;  %v614_v25 = vmul.f32 0.044715, %v584_v16 }
 0x1e4   :  { %732 = vst [vmem:[%s1261_s6 + $0x10] sm:$0xff] %v702_v14  ;;  %v557_v26 = vmul.f32 %v871_v2, %v871_v2  ;;  %v719_v27 = vmul.f32 %v689_v17, %v539_v63  ;;  %v631_v29 = vmul.f32 0.044715, %v601_v20  ;;  %v570_v30 = vmul.f32 %v1137_v57, %v1137_v57 }
 0x1e5   :  { %v675_v28 = vadd.f32 1.0, %v645_v18  ;;  %v1162_v31 = vpop.f32.mrf.mxu1  ;;  %v688_v32 = vadd.f32 1.0, %v658_v23  ;;  %v644_v33 = vadd.f32 %v614_v25, %v391_v46  ;;  %v541_v34 = vmul.f32 0.5, %v892_v48 }
 0x1e6   :  { %v587_v35 = vmul.f32 %v871_v2, %v557_v26  ;;  %749 = vst [vmem:[%s1261_s6 + $0x98] sm:$0xff] %v719_v27  ;;  %v661_v37 = vadd.f32 %v892_v48, %v631_v29  ;;  %v600_v38 = vmul.f32 %v570_v30, %v1137_v57  ;;  %v556_v39 = vmul.f32 %v401_v21, %v401_v21 }
 0x1e7   :  { %v705_v36 = vmul.f32 %v675_v28, %v525_v9  ;;  %v718_v41 = vmul.f32 %v688_v32, %v538_v19  ;;  %v674_v42 = vadd.f32 1.0, %v644_v33  ;;  %v527_v43 = vmul.f32 0.5, %v871_v2  ;;  %v1173_v50 = vpop.f32.mrf.mxu1 }
 0x1e8   :  { %v617_v44 = vmul.f32 0.044715, %v587_v35  ;;  %v691_v45 = vadd.f32 1.0, %v661_v37  ;;  %v630_v47 = vmul.f32 0.044715, %v600_v38  ;;  %v586_v46 = vmul.f32 %v556_v39, %v401_v21 }
 0x1e9   :  { %735 = vst [vmem:[%s1261_s6 + $0x28] sm:$0xff] %v705_v36  ;;  %v573_v49 = vmul.f32 %v1145_v3, %v1145_v3  ;;  %748 = vst [vmem:[%s1261_s6 + $0x90] sm:$0xff] %v718_v41  ;;  %v704_v48 = vmul.f32 %v674_v42, %v524_v24  ;;  %v540_v52 = vmul.f32 0.5, %v1137_v57  ;;  %v559_v53 = vmul.f32 %v874_v40, %v874_v40  ;;  %v1190_v4 = vpop.f32.mrf.mxu1 }
 0x1ea   :  { %v647_v51 = vadd.f32 %v871_v2, %v617_v44  ;;  %v721_v54 = vmul.f32 %v691_v45, %v541_v34  ;;  %v660_v55 = vadd.f32 %v630_v47, %v1137_v57  ;;  %v616_v56 = vmul.f32 0.044715, %v586_v46 }
 0x1eb   :  { %v603_v58 = vmul.f32 %v1145_v3, %v573_v49  ;;  %734 = vst [vmem:[%s1261_s6 + $0x20] sm:$0xff] %v704_v48  ;;  %v526_v61 = vmul.f32 0.5, %v401_v21  ;;  %v589_v62 = vmul.f32 %v874_v40, %v559_v53  ;;  %v572_v63 = vmul.f32 %v1150_v12, %v1150_v12 }
 0x1ec   :  { %v677_v59 = vadd.f32 1.0, %v647_v51  ;;  %751 = vst [vmem:[%s1261_s6 + $0xa8] sm:$0xff] %v721_v54  ;;  %v690_v0 = vadd.f32 1.0, %v660_v55  ;;  %v646_v57 = vadd.f32 %v616_v56, %v401_v21  ;;  %v543_v1 = vmul.f32 0.5, %v1145_v3  ;;  %v904_v21 = vpop.f32.mrf.mxu1 }
 0x1ed   :  { %v633_v2 = vmul.f32 0.044715, %v603_v58  ;;  %v619_v6 = vmul.f32 0.044715, %v589_v62  ;;  %v602_v7 = vmul.f32 %v572_v63, %v1150_v12  ;;  %v558_v8 = vmul.f32 %v411_v60, %v411_v60 }
 0x1ee   :  { %v707_v5 = vmul.f32 %v677_v59, %v527_v43  ;;  %v720_v9 = vmul.f32 %v690_v0, %v540_v52  ;;  %v676_v10 = vadd.f32 1.0, %v646_v57  ;;  %v529_v13 = vmul.f32 0.5, %v874_v40  ;;  %v511_v38 = vpop.f32.mrf.mxu1 }
 0x1ef   :  { %v663_v11 = vadd.f32 %v1145_v3, %v633_v2  ;;  %v649_v14 = vadd.f32 %v874_v40, %v619_v6  ;;  %v632_v15 = vmul.f32 0.044715, %v602_v7  ;;  %v588_v16 = vmul.f32 %v558_v8, %v411_v60 }
 0x1f0   :  { %737 = vst [vmem:[%s1261_s6 + $0x38] sm:$0xff] %v707_v5  ;;  %v575_v17 = vmul.f32 %v1152_v22, %v1152_v22  ;;  %750 = vst [vmem:[%s1261_s6 + $0xa0] sm:$0xff] %v720_v9  ;;  %v706_v18 = vmul.f32 %v676_v10, %v526_v61  ;;  %v542_v20 = vmul.f32 0.5, %v1150_v12  ;;  %v574_v3 = vmul.f32 %v1162_v31, %v1162_v31 }
 0x1f1   :  { %v693_v19 = vadd.f32 1.0, %v663_v11  ;;  %v679_v23 = vadd.f32 1.0, %v649_v14  ;;  %v662_v24 = vadd.f32 %v632_v15, %v1150_v12  ;;  %v618_v25 = vmul.f32 0.044715, %v588_v16 }
 0x1f2   :  { %v605_v26 = vmul.f32 %v1152_v22, %v575_v17  ;;  %736 = vst [vmem:[%s1261_s6 + $0x30] sm:$0xff] %v706_v18  ;;  %v528_v28 = vmul.f32 0.5, %v411_v60  ;;  %v604_v29 = vmul.f32 %v574_v3, %v1162_v31  ;;  %v577_v30 = vmul.f32 %v1173_v50, %v1173_v50 }
 0x1f3   :  { %v723_v27 = vmul.f32 %v693_v19, %v543_v1  ;;  %v709_v32 = vmul.f32 %v679_v23, %v529_v13  ;;  %v692_v33 = vadd.f32 1.0, %v662_v24  ;;  %v648_v34 = vadd.f32 %v618_v25, %v411_v60 }
 0x1f4   :  { %v635_v35 = vmul.f32 0.044715, %v605_v26  ;;  %v634_v12 = vmul.f32 0.044715, %v604_v29  ;;  %v607_v36 = vmul.f32 %v1173_v50, %v577_v30  ;;  %v576_v37 = vmul.f32 %v1190_v4, %v1190_v4 }
 0x1f5   :  { %753 = vst [vmem:[%s1261_s6 + $0xb8] sm:$0xff] %v723_v27  ;;  %739 = vst [vmem:[%s1261_s6 + $0x48] sm:$0xff] %v709_v32  ;;  %v722_v39 = vmul.f32 %v692_v33, %v542_v20  ;;  %v678_v40 = vadd.f32 1.0, %v648_v34  ;;  %v545_v41 = vmul.f32 0.5, %v1152_v22  ;;  %v579_v47 = vmul.f32 %v904_v21, %v904_v21 }
 0x1f6   :  { %v665_v42 = vadd.f32 %v1152_v22, %v635_v35  ;;  %v664_v43 = vadd.f32 %v634_v12, %v1162_v31  ;;  %v637_v44 = vmul.f32 0.044715, %v607_v36  ;;  %v606_v45 = vmul.f32 %v576_v37, %v1190_v4 }
 0x1f7   :  { %752 = vst [vmem:[%s1261_s6 + $0xb0] sm:$0xff] %v722_v39  ;;  %v708_v46 = vmul.f32 %v678_v40, %v528_v28  ;;  %v544_v48 = vmul.f32 0.5, %v1162_v31  ;;  %v578_v51 = vmul.f32 %v511_v38, %v511_v38  ;;  %v609_v22 = vmul.f32 %v904_v21, %v579_v47 }
 0x1f8   :  { %v695_v49 = vadd.f32 1.0, %v665_v42  ;;  %v694_v52 = vadd.f32 1.0, %v664_v43  ;;  %v667_v53 = vadd.f32 %v1173_v50, %v637_v44  ;;  %v636_v54 = vmul.f32 0.044715, %v606_v45 }
 0x1f9   :  { %738 = vst [vmem:[%s1261_s6 + $0x40] sm:$0xff] %v708_v46  ;;  %v547_v56 = vmul.f32 0.5, %v1173_v50  ;;  %v608_v58 = vmul.f32 %v578_v51, %v511_v38  ;;  %v639_v62 = vmul.f32 0.044715, %v609_v22  ;;  %v546_v0 = vmul.f32 0.5, %v1190_v4 }
 0x1fa   :  { %v725_v55 = vmul.f32 %v695_v49, %v545_v41  ;;  %v724_v60 = vmul.f32 %v694_v52, %v544_v48  ;;  %v697_v59 = vadd.f32 1.0, %v667_v53  ;;  %v666_v61 = vadd.f32 %v636_v54, %v1190_v4 }
 0x1fb   :  { %v638_v31 = vmul.f32 0.044715, %v608_v58  ;;  %v669_v50 = vadd.f32 %v904_v21, %v639_v62  ;;  %v549_v5 = vmul.f32 0.5, %v904_v21  ;;  %v548_v7 = vmul.f32 0.5, %v511_v38 }
 0x1fc   :  { %755 = vst [vmem:[%s1261_s6 + $0xc8] sm:$0xff] %v725_v55  ;;  %754 = vst [vmem:[%s1261_s6 + $0xc0] sm:$0xff] %v724_v60  ;;  %v727_v63 = vmul.f32 %v697_v59, %v547_v56  ;;  %v696_v57 = vadd.f32 1.0, %v666_v61 }
 0x1fd   :  { %v668_v1 = vadd.f32 %v638_v31, %v511_v38  ;;  %v699_v6 = vadd.f32 1.0, %v669_v50 }
 0x1fe   :  { %757 = vst [vmem:[%s1261_s6 + $0xd8] sm:$0xff] %v727_v63  ;;  %v726_v2 = vmul.f32 %v696_v57, %v546_v0 }
 0x1ff   :  { %v698_v8 = vadd.f32 1.0, %v668_v1  ;;  %v729_v9 = vmul.f32 %v699_v6, %v549_v5 }
 0x200   :  { %756 = vst [vmem:[%s1261_s6 + $0xd0] sm:$0xff] %v726_v2 }
 0x201   :  { %v728_v10 = vmul.f32 %v698_v8, %v548_v7  ;;  %759 = vst [vmem:[%s1261_s6 + $0xe8] sm:$0xff] %v729_v9 }
 0x203   :  { %758 = vst [vmem:[%s1261_s6 + $0xe0] sm:$0xff] %v728_v10 }

</bundles_post_ra>
